<compile_context>
chip_gen: v7x
topology: tpu7x:2x2x1
jax: 0.10.0
libtpu: 0.0.40
codegen_flags: <defaults>
</compile_context>

<pallas_src>
import jax
import jax.numpy as jnp
from jax.experimental import pallas as pl
from jax.experimental.pallas import tpu as pltpu


def _round_up(x, m):
    return ((x + m - 1) // m) * m


def attention_kernel(x_ref, xt_ref, xq_ref, w1_ref, b1_ref, w2_ref, o_ref):
    # One independent scorer per input stream.
    #   w1_ref : (3, D, Hp)   (act dtype; resident in VMEM)
    #   b1_ref : (3, Hp)      (f32; resident)
    #   w2_ref : (3, Hp)      (f32; resident)
    def score(inp_ref, idx):
        h = jnp.dot(inp_ref[...], w1_ref[idx],
                    preferred_element_type=jnp.float32)        # MXU, f32 accumulate
        h = jnp.tanh(h + b1_ref[idx])                          # f32 bias + EUP tanh
        # Second projection (H -> 1) as VPU multiply + XLU lane reduction; pad
        # columns contribute exactly zero, so summing the full 128 lanes is exact.
        return jnp.sum(h * w2_ref[idx], axis=-1, keepdims=True)

    s = jnp.concatenate([score(x_ref, 0), score(xt_ref, 1), score(xq_ref, 2)],
                        axis=-1)                                # (tb, 3) f32
    # Numerically-stable softmax over the 3 scores, in f32.
    s = s - jnp.max(s, axis=-1, keepdims=True)
    e = jnp.exp(s)
    o_ref[...] = (e / jnp.sum(e, axis=-1, keepdims=True)).astype(o_ref.dtype)


def pack_params(params, hidden_pad, act_dtype):
    """Stack per-scorer weights with the hidden dim padded to `hidden_pad` lanes."""
    D, H = params["w1x"].shape
    pad_h = hidden_pad - H
    w1 = jnp.stack([jnp.pad(params[f"w1{n}"].astype(act_dtype), ((0, 0), (0, pad_h)))
                    for n in ("x", "t", "q")])                  # (3, D, Hp)
    b1 = jnp.stack([jnp.pad(params[f"b1{n}"].reshape(-1).astype(jnp.float32), (0, pad_h))
                    for n in ("x", "t", "q")])                  # (3, Hp), f32
    w2 = jnp.stack([jnp.pad(params[f"w2{n}"][:, 0].astype(jnp.float32), (0, pad_h))
                    for n in ("x", "t", "q")])                  # (3, Hp), f32
    return w1, b1, w2


def attention_forward(x, xt, xq, params, *, tb=None, tb_max=8192,
                      act_dtype=jnp.float32,
                      vmem_limit_bytes=32 * 1024 * 1024):
    B, D = x.shape
    H = params["w1x"].shape[1]
    Hp = _round_up(H, 128)                                      # 64 -> 128

    w1_all, b1_all, w2_all = pack_params(params, Hp, act_dtype)

    # Adaptive batch tile: big enough to amortize the ~0.35us/step overhead, but
    # chosen from cdiv(B, num_tiles) so padding is at most a few rows.
    if tb is None:
        num_tiles = pl.cdiv(B, tb_max)
        tb = _round_up(pl.cdiv(B, num_tiles), 8)
    tb = max(8, _round_up(tb, 8))
    grid = pl.cdiv(B, tb)
    Bp = grid * tb

    x = x.astype(act_dtype)
    xt = xt.astype(act_dtype)
    xq = xq.astype(act_dtype)
    if Bp != B:
        pad = ((0, Bp - B), (0, 0))
        x = jnp.pad(x, pad)
        xt = jnp.pad(xt, pad)
        xq = jnp.pad(xq, pad)                                    # garbage rows sliced off below

    out = pl.pallas_call(
        attention_kernel,
        out_shape=jax.ShapeDtypeStruct((Bp, 3), jnp.float32),
        grid_spec=pltpu.PrefetchScalarGridSpec(
            num_scalar_prefetch=0,
            grid=(grid,),
            in_specs=[
                pl.BlockSpec((tb, D), lambda i: (i, 0)),         # x   (streamed)
                pl.BlockSpec((tb, D), lambda i: (i, 0)),         # xt  (streamed)
                pl.BlockSpec((tb, D), lambda i: (i, 0)),         # xq  (streamed)
                pl.BlockSpec((3, D, Hp), lambda i: (0, 0, 0)),   # W1 stack (resident)
                pl.BlockSpec((3, Hp), lambda i: (0, 0)),         # biases   (resident)
                pl.BlockSpec((3, Hp), lambda i: (0, 0)),         # w2 rows  (resident)
            ],
            out_specs=pl.BlockSpec((tb, 3), lambda i: (i, 0)),   # narrow output is fine
        ),
        compiler_params=pltpu.CompilerParams(
            dimension_semantics=("parallel",),                   # megacore-shardable grid
            vmem_limit_bytes=vmem_limit_bytes,                   # safe on v7x; raise on v6e/v5e
        ),
    )(x, xt, xq, w1_all, b1_all, w2_all)

    return out[:B]


def init_params(key, in_size, hidden_size):
    """Deterministic init mimicking nn.Linear's U(-1/sqrt(fan_in), 1/sqrt(fan_in))."""
    params = {}
    for name in ("x", "t", "q"):
        key, k1, k2, k3 = jax.random.split(key, 4)
        bound1 = 1.0 / jnp.sqrt(in_size)
        bound2 = 1.0 / jnp.sqrt(hidden_size)
        params[f"w1{name}"] = jax.random.uniform(
            k1, (in_size, hidden_size), jnp.float32, -bound1, bound1)
        params[f"b1{name}"] = jax.random.uniform(
            k2, (1, hidden_size), jnp.float32, -bound1, bound1)
        params[f"w2{name}"] = jax.random.uniform(
            k3, (hidden_size, 1), jnp.float32, -bound2, bound2)
    return params


def reference_forward(x, xt, xq, p):
    def score(inp, w1, b1, w2):
        return jnp.tanh(inp @ w1 + b1) @ w2
    a = jnp.concatenate(
        [score(x,  p["w1x"], p["b1x"], p["w2x"]),
         score(xt, p["w1t"], p["b1t"], p["w2t"]),
         score(xq, p["w1q"], p["b1q"], p["w2q"])], axis=1)
    return jax.nn.softmax(a, axis=1)


if __name__ == "__main__":
    B, in_size, hidden = 8, 32, 64

    key = jax.random.PRNGKey(0)
    kx, kt, kq, kp = jax.random.split(key, 4)
    x = jax.random.normal(kx, (B, in_size), jnp.float32)
    xt = jax.random.normal(kt, (B, in_size), jnp.float32)
    xq = jax.random.normal(kq, (B, in_size), jnp.float32)
    params = init_params(kp, in_size, hidden)

    # f32 path (reference-accurate).
    out = jax.block_until_ready(attention_forward(x, xt, xq, params))
    ref = reference_forward(x, xt, xq, params)
    assert out.shape == (B, 3)
    assert bool(jnp.allclose(out, ref, atol=1e-5, rtol=1e-5))

    # bf16-storage deployment path (halves streamed HBM bytes); accumulation,
    # tanh and softmax stay f32.
    out_bf16 = jax.block_until_ready(
        attention_forward(x, xt, xq, params, act_dtype=jnp.bfloat16))
    assert bool(jnp.allclose(out_bf16, ref, atol=5e-2))

    # Multi-tile grid + batch padding path (exercises the pipelined BlockSpec).
    B2 = 50
    k2x, k2t, k2q = jax.random.split(jax.random.PRNGKey(1), 3)
    x2 = jax.random.normal(k2x, (B2, in_size), jnp.float32)
    xt2 = jax.random.normal(k2t, (B2, in_size), jnp.float32)
    xq2 = jax.random.normal(k2q, (B2, in_size), jnp.float32)
    out2 = jax.block_until_ready(attention_forward(x2, xt2, xq2, params, tb=16))
    ref2 = reference_forward(x2, xt2, xq2, params)
    assert out2.shape == (B2, 3)
    assert bool(jnp.allclose(out2, ref2, atol=1e-5, rtol=1e-5))

    # Adaptive-tile path (B not a power of two; near-zero padding by construction).
    B3 = 1000
    k3x, k3t, k3q = jax.random.split(jax.random.PRNGKey(2), 3)
    x3 = jax.random.normal(k3x, (B3, in_size), jnp.float32)
    xt3 = jax.random.normal(k3t, (B3, in_size), jnp.float32)
    xq3 = jax.random.normal(k3q, (B3, in_size), jnp.float32)
    out3 = jax.block_until_ready(attention_forward(x3, xt3, xq3, params))
    ref3 = reference_forward(x3, xt3, xq3, params)
    assert out3.shape == (B3, 3)
    assert bool(jnp.allclose(out3, ref3, atol=1e-5, rtol=1e-5))

    print("KERNEL_OK")
</pallas_src>

<mosaic_0001>
module attributes {stable_mosaic.version = 11 : i64} {
  func.func @attention_kernel(%arg0: i32, %arg1: memref<8x32xf32, #tpu.memory_space<vmem>>, %arg2: memref<8x32xf32, #tpu.memory_space<vmem>>, %arg3: memref<8x32xf32, #tpu.memory_space<vmem>>, %arg4: memref<3x32x128xf32, #tpu.memory_space<vmem>>, %arg5: memref<3x128xf32, #tpu.memory_space<vmem>>, %arg6: memref<3x128xf32, #tpu.memory_space<vmem>>, %arg7: memref<8x3xf32, #tpu.memory_space<vmem>>) attributes {dimension_semantics = [#tpu.dimension_semantics<parallel>], iteration_bounds = array<i64: 1>, scalar_prefetch = 0 : i64, scratch_operands = 0 : i64, tpu.core_type = #tpu.core_type<tc>, window_params = [{transform_indices = @transform_0, window_bounds = array<i64: 8, 32>}, {transform_indices = @transform_1, window_bounds = array<i64: 8, 32>}, {transform_indices = @transform_2, window_bounds = array<i64: 8, 32>}, {pipeline_mode = #tpu.pipeline_mode<synchronous>, transform_indices = @transform_3, window_bounds = array<i64: 3, 32, 128>}, {pipeline_mode = #tpu.pipeline_mode<synchronous>, transform_indices = @transform_4, window_bounds = array<i64: 3, 128>}, {pipeline_mode = #tpu.pipeline_mode<synchronous>, transform_indices = @transform_5, window_bounds = array<i64: 3, 128>}, {transform_indices = @transform_6, window_bounds = array<i64: 8, 3>}]} {
    %c0 = arith.constant 0 : index
    %c0_0 = arith.constant 0 : index
    %0 = vector.load %arg1[%c0, %c0_0] : memref<8x32xf32, #tpu.memory_space<vmem>>, vector<8x32xf32>
    %c0_1 = arith.constant 0 : index
    %c0_2 = arith.constant 0 : index
    %c0_3 = arith.constant 0 : index
    %1 = vector.load %arg4[%c0_1, %c0_2, %c0_3] : memref<3x32x128xf32, #tpu.memory_space<vmem>>, vector<1x32x128xf32>
    %2 = vector.shape_cast %1 : vector<1x32x128xf32> to vector<32x128xf32>
    %cst = arith.constant dense<0.000000e+00> : vector<8x128xf32>
    %3 = tpu.matmul %0, %2, %cst {dimension_numbers = #tpu.dot_dimension_numbers<[1], [0], [0], [1], [0, 0, 1, 1], [], []>} : vector<8x32xf32>, vector<32x128xf32>, vector<8x128xf32> -> vector<8x128xf32>
    %c0_4 = arith.constant 0 : index
    %c0_5 = arith.constant 0 : index
    %4 = vector.load %arg5[%c0_4, %c0_5] : memref<3x128xf32, #tpu.memory_space<vmem>>, vector<1x128xf32>
    %5 = vector.shape_cast %4 : vector<1x128xf32> to vector<128xf32>
    %6 = vector.shape_cast %5 : vector<128xf32> to vector<1x128xf32>
    %7 = vector.broadcast %6 : vector<1x128xf32> to vector<8x128xf32>
    %8 = arith.addf %3, %7 : vector<8x128xf32>
    %9 = math.tanh %8 : vector<8x128xf32>
    %c0_6 = arith.constant 0 : index
    %c0_7 = arith.constant 0 : index
    %10 = vector.load %arg6[%c0_6, %c0_7] : memref<3x128xf32, #tpu.memory_space<vmem>>, vector<1x128xf32>
    %11 = vector.shape_cast %10 : vector<1x128xf32> to vector<128xf32>
    %12 = vector.shape_cast %11 : vector<128xf32> to vector<1x128xf32>
    %13 = vector.broadcast %12 : vector<1x128xf32> to vector<8x128xf32>
    %14 = arith.mulf %9, %13 : vector<8x128xf32>
    %cst_8 = arith.constant dense<0.000000e+00> : vector<8xf32>
    %15 = vector.multi_reduction <add>, %14, %cst_8 [1] : vector<8x128xf32> to vector<8xf32>
    %16 = vector.shape_cast %15 : vector<8xf32> to vector<8x1xf32>
    %c0_9 = arith.constant 0 : index
    %c0_10 = arith.constant 0 : index
    %17 = vector.load %arg2[%c0_9, %c0_10] : memref<8x32xf32, #tpu.memory_space<vmem>>, vector<8x32xf32>
    %c1 = arith.constant 1 : index
    %c0_11 = arith.constant 0 : index
    %c0_12 = arith.constant 0 : index
    %18 = vector.load %arg4[%c1, %c0_11, %c0_12] : memref<3x32x128xf32, #tpu.memory_space<vmem>>, vector<1x32x128xf32>
    %19 = vector.shape_cast %18 : vector<1x32x128xf32> to vector<32x128xf32>
    %cst_13 = arith.constant dense<0.000000e+00> : vector<8x128xf32>
    %20 = tpu.matmul %17, %19, %cst_13 {dimension_numbers = #tpu.dot_dimension_numbers<[1], [0], [0], [1], [0, 0, 1, 1], [], []>} : vector<8x32xf32>, vector<32x128xf32>, vector<8x128xf32> -> vector<8x128xf32>
    %c1_14 = arith.constant 1 : index
    %c0_15 = arith.constant 0 : index
    %21 = vector.load %arg5[%c1_14, %c0_15] : memref<3x128xf32, #tpu.memory_space<vmem>>, vector<1x128xf32>
    %22 = vector.shape_cast %21 : vector<1x128xf32> to vector<128xf32>
    %23 = vector.shape_cast %22 : vector<128xf32> to vector<1x128xf32>
    %24 = vector.broadcast %23 : vector<1x128xf32> to vector<8x128xf32>
    %25 = arith.addf %20, %24 : vector<8x128xf32>
    %26 = math.tanh %25 : vector<8x128xf32>
    %c1_16 = arith.constant 1 : index
    %c0_17 = arith.constant 0 : index
    %27 = vector.load %arg6[%c1_16, %c0_17] : memref<3x128xf32, #tpu.memory_space<vmem>>, vector<1x128xf32>
    %28 = vector.shape_cast %27 : vector<1x128xf32> to vector<128xf32>
    %29 = vector.shape_cast %28 : vector<128xf32> to vector<1x128xf32>
    %30 = vector.broadcast %29 : vector<1x128xf32> to vector<8x128xf32>
    %31 = arith.mulf %26, %30 : vector<8x128xf32>
    %cst_18 = arith.constant dense<0.000000e+00> : vector<8xf32>
    %32 = vector.multi_reduction <add>, %31, %cst_18 [1] : vector<8x128xf32> to vector<8xf32>
    %33 = vector.shape_cast %32 : vector<8xf32> to vector<8x1xf32>
    %c0_19 = arith.constant 0 : index
    %c0_20 = arith.constant 0 : index
    %34 = vector.load %arg3[%c0_19, %c0_20] : memref<8x32xf32, #tpu.memory_space<vmem>>, vector<8x32xf32>
    %c2 = arith.constant 2 : index
    %c0_21 = arith.constant 0 : index
    %c0_22 = arith.constant 0 : index
    %35 = vector.load %arg4[%c2, %c0_21, %c0_22] : memref<3x32x128xf32, #tpu.memory_space<vmem>>, vector<1x32x128xf32>
    %36 = vector.shape_cast %35 : vector<1x32x128xf32> to vector<32x128xf32>
    %cst_23 = arith.constant dense<0.000000e+00> : vector<8x128xf32>
    %37 = tpu.matmul %34, %36, %cst_23 {dimension_numbers = #tpu.dot_dimension_numbers<[1], [0], [0], [1], [0, 0, 1, 1], [], []>} : vector<8x32xf32>, vector<32x128xf32>, vector<8x128xf32> -> vector<8x128xf32>
    %c2_24 = arith.constant 2 : index
    %c0_25 = arith.constant 0 : index
    %38 = vector.load %arg5[%c2_24, %c0_25] : memref<3x128xf32, #tpu.memory_space<vmem>>, vector<1x128xf32>
    %39 = vector.shape_cast %38 : vector<1x128xf32> to vector<128xf32>
    %40 = vector.shape_cast %39 : vector<128xf32> to vector<1x128xf32>
    %41 = vector.broadcast %40 : vector<1x128xf32> to vector<8x128xf32>
    %42 = arith.addf %37, %41 : vector<8x128xf32>
    %43 = math.tanh %42 : vector<8x128xf32>
    %c2_26 = arith.constant 2 : index
    %c0_27 = arith.constant 0 : index
    %44 = vector.load %arg6[%c2_26, %c0_27] : memref<3x128xf32, #tpu.memory_space<vmem>>, vector<1x128xf32>
    %45 = vector.shape_cast %44 : vector<1x128xf32> to vector<128xf32>
    %46 = vector.shape_cast %45 : vector<128xf32> to vector<1x128xf32>
    %47 = vector.broadcast %46 : vector<1x128xf32> to vector<8x128xf32>
    %48 = arith.mulf %43, %47 : vector<8x128xf32>
    %cst_28 = arith.constant dense<0.000000e+00> : vector<8xf32>
    %49 = vector.multi_reduction <add>, %48, %cst_28 [1] : vector<8x128xf32> to vector<8xf32>
    %50 = vector.shape_cast %49 : vector<8xf32> to vector<8x1xf32>
    %51 = tpu.concatenate %16, %33, %50 in 1 : vector<8x1xf32>, vector<8x1xf32>, vector<8x1xf32> -> vector<8x3xf32>
    %cst_29 = arith.constant dense<0xFF800000> : vector<8xf32>
    %52 = vector.multi_reduction <maximumf>, %51, %cst_29 [1] : vector<8x3xf32> to vector<8xf32>
    %53 = vector.shape_cast %52 : vector<8xf32> to vector<8x1xf32>
    %54 = vector.broadcast %53 : vector<8x1xf32> to vector<8x3xf32>
    %55 = arith.subf %51, %54 : vector<8x3xf32>
    %56 = math.exp %55 : vector<8x3xf32>
    %cst_30 = arith.constant dense<0.000000e+00> : vector<8xf32>
    %57 = vector.multi_reduction <add>, %56, %cst_30 [1] : vector<8x3xf32> to vector<8xf32>
    %58 = vector.shape_cast %57 : vector<8xf32> to vector<8x1xf32>
    %59 = vector.broadcast %58 : vector<8x1xf32> to vector<8x3xf32>
    %60 = arith.divf %56, %59 : vector<8x3xf32>
    %c0_31 = arith.constant 0 : index
    %c0_32 = arith.constant 0 : index
    %61 = vector.load %arg7[%c0_31, %c0_32] : memref<8x3xf32, #tpu.memory_space<vmem>>, vector<8x3xf32>
    tpu.vector_store %arg7[%c0_31, %c0_32], %60 {strides = array<i32>} : memref<8x3xf32, #tpu.memory_space<vmem>>, vector<8x3xf32>,
    return
  }
  func.func @transform_0(%arg0: i32) -> (i32, i32) {
    %c0_i32 = arith.constant 0 : i32
    %c0_i32_0 = arith.constant 0 : i32
    return %arg0, %c0_i32 : i32, i32
  }
  func.func @transform_1(%arg0: i32) -> (i32, i32) {
    %c0_i32 = arith.constant 0 : i32
    %c0_i32_0 = arith.constant 0 : i32
    return %arg0, %c0_i32 : i32, i32
  }
  func.func @transform_2(%arg0: i32) -> (i32, i32) {
    %c0_i32 = arith.constant 0 : i32
    %c0_i32_0 = arith.constant 0 : i32
    return %arg0, %c0_i32 : i32, i32
  }
  func.func @transform_3(%arg0: i32) -> (i32, i32, i32) {
    %c0_i32 = arith.constant 0 : i32
    %c0_i32_0 = arith.constant 0 : i32
    %c0_i32_1 = arith.constant 0 : i32
    %c0_i32_2 = arith.constant 0 : i32
    return %c0_i32, %c0_i32_0, %c0_i32_1 : i32, i32, i32
  }
  func.func @transform_4(%arg0: i32) -> (i32, i32) {
    %c0_i32 = arith.constant 0 : i32
    %c0_i32_0 = arith.constant 0 : i32
    %c0_i32_1 = arith.constant 0 : i32
    return %c0_i32, %c0_i32_0 : i32, i32
  }
  func.func @transform_5(%arg0: i32) -> (i32, i32) {
    %c0_i32 = arith.constant 0 : i32
    %c0_i32_0 = arith.constant 0 : i32
    %c0_i32_1 = arith.constant 0 : i32
    return %c0_i32, %c0_i32_0 : i32, i32
  }
  func.func @transform_6(%arg0: i32) -> (i32, i32) {
    %c0_i32 = arith.constant 0 : i32
    %c0_i32_0 = arith.constant 0 : i32
    return %arg0, %c0_i32 : i32, i32
  }
}

</mosaic_0001>

<bundles_post_ra>
// kernel: tpu_custom_call.1
= control target key start
LH: loop header
LB: loop body
LE: loop exit
PB: predicated region body
PF: predicated region fallthrough
CT: control target
= control target key end

     0   :  { %11 = vsyncpa [#allocation3], 0  ;;  %s689_s0 = inlined_call_operand.hbm [shape: f32[8,32], index: 0, kind: input, shape index: {}]   ;;  %s690_s1 = inlined_call_operand.hbm [shape: f32[8,32], index: 1, kind: input, shape index: {}]   ;;  %s691_s2 = inlined_call_operand.hbm [shape: f32[8,32], index: 2, kind: input, shape index: {}]   ;;  %s692_s3 = inlined_call_operand.hbm [shape: f32[3,32,128], index: 3, kind: input, shape index: {}]   ;;  %s693_s4 = inlined_call_operand.vmem [shape: f32[3,128], index: 4, kind: input, shape index: {}]   ;;  %s694_s5 = inlined_call_operand.vmem [shape: f32[3,128], index: 5, kind: input, shape index: {}]   ;;  %s695_s6 = inlined_call_operand.vmem [shape: f32[8,3], index: 6, kind: output, shape index: {}]  }
   0x1   :  { %12 = vsyncpa [#allocation5], 0 }
   0x2   :  { %13 = vsyncpa [#allocation8], 0  ;;  %s563_s21 = smov [#allocation4]   ;;  %s564_s23 = smov [#allocation2]  }
   0x3   :  { %s30_s22 = sshll.u32 %s563_s21, 4  ;;  %s20_s24 = sshll.u32 %s564_s23, 4  ;;  %s31_s22 = int_to_ptr.vmem [resolvable:$true] %s30_s22  ;;  %s21_s24 = int_to_ptr.vmem [resolvable:$true] %s20_s24 }
   0x4   :  { %s469_s27 = scalar_lea.hbm %s690_s1, 128 }
   0x5   :  { %p470_p0 = scmp.ne.s32.totalorder %s690_s1, %s469_s27  ;;  %p473_p1 = scmp.lt.u32.totalorder %s469_s27, %s690_s1 }
   0x7   :  { %p475_p2 = pnand %p473_p1, %p470_p0 }
   0x9   :  { %478 = shalt.err (!%p475_p2)
}
   0xa   :  { %s479_s8 = scalar_lea.vmem %s31_s22, 128  ;;  %p484_p4 = scmp.lt.s32.totalorder %s31_s22, %s31_s22 }
   0xb   :  { %p480_p3 = scmp.ne.s32.totalorder %s31_s22, %s479_s8  ;;  %p485_p5 = scmp.lt.s32.totalorder %s479_s8, %s479_s8 }
   0xd   :  { %p486_p6 = por %p485_p5, %p484_p4 }
   0xf   :  { %p487_p7 = pnand %p486_p6, %p480_p3 }
  0x11   :  { %490 = shalt.err (!%p487_p7)
}
  0x12   :  { %33 = dma.hbm_to_vmem [thread:$0]  %s690_s1, 128, %s31_s22, [#allocation5]  }
  0x13   :  { %s491_s13 = scalar_lea.hbm %s689_s0, 128 }
  0x14   :  { %p492_p8 = scmp.ne.s32.totalorder %s689_s0, %s491_s13  ;;  %p495_p9 = scmp.lt.u32.totalorder %s491_s13, %s689_s0 }
  0x16   :  { %p497_p10 = pnand %p495_p9, %p492_p8 }
  0x18   :  { %500 = shalt.err (!%p497_p10)
}
  0x19   :  { %s501_s18 = scalar_lea.vmem %s21_s24, 128  ;;  %p506_p12 = scmp.lt.s32.totalorder %s21_s24, %s21_s24 }
  0x1a   :  { %p502_p11 = scmp.ne.s32.totalorder %s21_s24, %s501_s18  ;;  %p507_p13 = scmp.lt.s32.totalorder %s501_s18, %s501_s18 }
  0x1c   :  { %p508_p0 = por %p507_p13, %p506_p12 }
  0x1e   :  { %p509_p1 = pnand %p508_p0, %p502_p11 }
  0x20   :  { %512 = shalt.err (!%p509_p1)
}
  0x21   :  { %23 = dma.hbm_to_vmem [thread:$0]  %s689_s0, 128, %s21_s24, [#allocation3]  }
  0x22   :  { %s565_s20 = smov [#allocation6]   ;;  %s566_s22 = smov [#allocation7]  }
  0x23   :  { %s40_s21 = sshll.u32 %s565_s20, 4  ;;  %s49_s23 = sshll.u32 %s566_s22, 4  ;;  %s41_s21 = int_to_ptr.vmem [resolvable:$true] %s40_s21  ;;  %s631_s23 = int_to_ptr.vmem [resolvable:$true] %s49_s23 }
  0x24   :  { %s513_s27 = scalar_lea.hbm %s691_s2, 128 }
  0x25   :  { %p514_p2 = scmp.ne.s32.totalorder %s691_s2, %s513_s27  ;;  %p517_p3 = scmp.lt.u32.totalorder %s513_s27, %s691_s2 }
  0x27   :  { %p519_p4 = pnand %p517_p3, %p514_p2 }
  0x29   :  { %522 = shalt.err (!%p519_p4)
}
  0x2a   :  { %s523_s0 = scalar_lea.vmem %s41_s21, 128  ;;  %p528_p6 = scmp.lt.s32.totalorder %s41_s21, %s41_s21 }
  0x2b   :  { %p524_p5 = scmp.ne.s32.totalorder %s41_s21, %s523_s0  ;;  %p529_p7 = scmp.lt.s32.totalorder %s523_s0, %s523_s0 }
  0x2d   :  { %p530_p8 = por %p529_p7, %p528_p6 }
  0x2f   :  { %p531_p9 = pnand %p530_p8, %p524_p5 }
  0x31   :  { %534 = shalt.err (!%p531_p9)
}
  0x32   :  { %43 = dma.hbm_to_vmem [thread:$0]  %s691_s2, 128, %s41_s21, [#allocation5]  }
  0x33   :  { %s535_s11 = scalar_lea.hbm %s692_s3, 1536 }
  0x34   :  { %p536_p10 = scmp.ne.s32.totalorder %s692_s3, %s535_s11  ;;  %p539_p11 = scmp.lt.u32.totalorder %s535_s11, %s692_s3 }
  0x36   :  { %p541_p12 = pnand %p539_p11, %p536_p10 }
  0x38   :  { %544 = shalt.err (!%p541_p12)
}
  0x39   :  { %s545_s16 = scalar_lea.vmem %s631_s23, 1536  ;;  %p550_p0 = scmp.lt.s32.totalorder %s631_s23, %s631_s23 }
  0x3a   :  { %p546_p13 = scmp.ne.s32.totalorder %s631_s23, %s545_s16  ;;  %p551_p1 = scmp.lt.s32.totalorder %s545_s16, %s545_s16 }
  0x3c   :  { %p552_p2 = por %p551_p1, %p550_p0 }
  0x3e   :  { %p553_p3 = pnand %p552_p2, %p546_p13 }
  0x40   :  { %556 = shalt.err (!%p553_p3)
}
  0x41   :  { %s567_s2 = smov 128   ;;  %s568_s17 = smov 8  }
  0x42   :  { %55 = dma.hbm_to_vmem [thread:$0]  %s692_s3, 1536, %s631_s23, [#allocation8], %s567_s2, %s567_s2, %s568_s17  }
  0x43   :  { %557 = dma.done.wait [#allocation3], 128  }
  0x44   :  { %558 = vsyncadd [#allocation3], 4294967168 }
  0x45   :  { %559 = dma.done.wait [#allocation5], 256  }
  0x46   :  { %560 = vsyncadd [#allocation5], 4294967040 }
  0x47   :  { %561 = dma.done.wait [#allocation8], 1536  }
  0x48   :  { %562 = vsyncadd [#allocation8], 4294965760  ;;  %v569_v0 = vmov 0.0|0.0   ;;  %vm570_vm0 = vmmov 0   ;;  %v571_v1 = vmov 0.0   ;;  %v73_v2 = vld [vmem:[#allocation7] sm:$0xff] }
  0x49   :  { %432 = vmatprep.subr.bf16.mxu0 %v569_v0  ;;  %438 = vmatprep.subr.bf16.mxu1 %v569_v0  ;;  %v74_v3 = vld [vmem:[#allocation7 + $0x8] sm:$0xff]  ;;  %v75_v4 = vld [vmem:[#allocation7 + $0x10] sm:$0xff]  ;;  %v76_v6 = vld [vmem:[#allocation7 + $0x18] sm:$0xff]  ;;  %vm82_vm1 = vcmask 261120   ;;  %vm351_vm2 = vcmask 7168   ;;  %vm353_vm3 = vcmask 15360  }
  0x4a   :  { %407 = vmatprep.mubr.msk.f32.mxu0 %vm570_vm0, %v571_v1  ;;  %418 = vmatprep.mubr.msk.f32.mxu1 %vm570_vm0, %v571_v1  ;;  %v433_v5 = vpack.c.bf16 %v74_v3, %v73_v2  ;;  %v167_v7 = vld [vmem:[#allocation7 + $0x20] sm:$0xff]  ;;  %v168_v8 = vld [vmem:[#allocation7 + $0x28] sm:$0xff]  ;;  %v169_v10 = vld [vmem:[#allocation7 + $0x30] sm:$0xff]  ;;  %v436_v12 = vpack.c.bf16 %v76_v6, %v75_v4  ;;  %vm355_vm4 = vcmask 23552  }
  0x4b   :  { %v439_v9 = vpack.c.bf16 %v168_v8, %v167_v7  ;;  %v170_v11 = vld [vmem:[#allocation7 + $0x38] sm:$0xff]  ;;  %v260_v14 = vld [vmem:[#allocation7 + $0x40] sm:$0xff]  ;;  %v261_v15 = vld [vmem:[#allocation7 + $0x48] sm:$0xff] }
  0x4c   :  { %434 = vmatpush3.bf16.msra.mxu0 %v433_v5  ;;  %v442_v13 = vpack.c.bf16 %v170_v11, %v169_v10  ;;  %v72_v16 = vld [vmem:[#allocation2] sm:$0xff]  ;;  %v445_v17 = vpack.c.bf16 %v261_v15, %v260_v14  ;;  %v165_v18 = vld [vmem:[#allocation4] sm:$0xff]  ;;  %v263_v20 = vld [vmem:[#allocation7 + $0x58] sm:$0xff] }
  0x4d   :  { %435 = vmatprep.subr.bf16.mxu0 %v569_v0  ;;  %440 = vmatpush3.bf16.msra.mxu1 %v439_v9  ;;  %v262_v19 = vld [vmem:[#allocation7 + $0x50] sm:$0xff]  ;;  %v258_v22 = vld [vmem:[#allocation6] sm:$0xff]  ;;  %v375_v23 = vld [vmem:[%s693_s4] ss:$0 sm:$0xff] }
  0x4e   :  { %441 = vmatprep.subr.bf16.mxu1 %v569_v0  ;;  %v448_v21 = vpack.c.bf16 %v263_v20, %v262_v19  ;;  %v378_v24 = vld [vmem:[%s693_s4 + $0x1] ss:$0 sm:$0xff]  ;;  %v381_v31 = vld [vmem:[%s693_s4 + $0x2] ss:$0 sm:$0xff]  ;;  %v377_v35 = vld [vmem:[%s694_s5] ss:$0 sm:$0xff] }
  0x4f   :  { %v380_v37 = vld [vmem:[%s694_s5 + $0x1] ss:$0 sm:$0xff]  ;;  %v383_v41 = vld [vmem:[%s694_s5 + $0x2] ss:$0 sm:$0xff] }
  0x50   :  { %437 = vmatpush3.bf16.msra.mxu0 %v436_v12 }
  0x51   :  { %444 = vmatprep.subr.bf16.mxu0 %v569_v0  ;;  %443 = vmatpush3.bf16.msra.mxu1 %v442_v13 }
  0x53   :  { %408 = vmatmul.mubr.msk.f32.vlgmr.msra.gmra.mrb[0].mxu0 %vm82_vm1, %v72_v16 }
  0x54   :  { %446 = vmatpush3.bf16.msra.mxu0 %v445_v17  ;;  %419 = vmatmul.mubr.msk.f32.vlgmr.msra.gmra.mrb[0].mxu1 %vm82_vm1, %v165_v18 }
  0x55   :  { %447 = vmatprep.subr.bf16.mxu0 %v569_v0  ;;  %429 = vmatprep.mubr.msk.f32.mxu0 %vm570_vm0, %v571_v1 }
  0x58   :  { %449 = vmatpush3.bf16.msra.mxu0 %v448_v21 }
  0x5b   :  { %430 = vmatmul.mubr.msk.f32.vlgmr.msra.gmra.mrb[2].mxu0 %vm82_vm1, %v258_v22 }
 0x126   :  { %v152_v25 = vpop.f32.mrb[0].mxu0 }
 0x127   :  { %v153_v26 = vadd.f32 %v375_v23, %v152_v25  ;;  %v409_v27 = vpop.f32.mrb[1].mxu0  ;;  %v245_v28 = vpop.f32.mrb[0].mxu1 }
 0x128   :  { %v246_v29 = vadd.f32 %v378_v24, %v245_v28  ;;  %v420_v30 = vpop.f32.mrb[1].mxu1 }
 0x129   :  { %459 = vtanh.f32 %v153_v26 }
 0x12a   :  { %461 = vtanh.f32 %v246_v29 }
 0x12e   :  { %v338_v32 = vpop.f32.mrb[2].mxu0 }
 0x12f   :  { %v339_v33 = vadd.f32 %v381_v31, %v338_v32  ;;  %v431_v34 = vpop.f32.mrb[3].mxu0 }
 0x131   :  { %463 = vtanh.f32 %v339_v33 }
 0x133   :  { %v460_v36 = vpop.eup %459 }
 0x134   :  { %v462_v38 = vpop.eup %461  ;;  %v162_v39 = vmul.f32 %v460_v36, %v377_v35 }
 0x135   :  { %v255_v40 = vmul.f32 %v462_v38, %v380_v37 }
 0x136   :  { %163 = vadd.xlane.f32.xlu0 %v162_v39 }
 0x13a   :  { %256 = vadd.xlane.f32.xlu0 %v255_v40 }
 0x13b   :  { %v464_v42 = vpop.eup %463 }
 0x13c   :  { %v348_v43 = vmul.f32 %v464_v42, %v383_v41 }
 0x13e   :  { %349 = vadd.xlane.f32.xlu1 %v348_v43 }
 0x1c3   :  { %v164_v44 = vpop.xlane.xlu0 %163 }
 0x1c7   :  { %v257_v45 = vpop.xlane.xlu0 %256 }
 0x1c8   :  { %v352_v46 = vsel %vm351_vm2, %v164_v44, %v257_v45 }
 0x1cb   :  { %v350_v47 = vpop.xlane.xlu1 %349 }
 0x1cc   :  { %v354_v48 = vsel %vm353_vm3, %v352_v46, %v350_v47 }
 0x1cd   :  { %v356_v49 = vsel %vm355_vm4, %v354_v48, -inf }
 0x1ce   :  { %357 = vmax.xlane.f32.xlu1 %v356_v49 }
 0x25b   :  { %v358_v50 = vpop.xlane.xlu1 %357 }
 0x25c   :  { %v359_v51 = vsub.f32 %v354_v48, %v358_v50 }
 0x25e   :  { %v360_v52 = vmul.f32 1.442695, %v359_v51 }
 0x260   :  { %465 = vpow2.f32 %v360_v52 }
 0x26a   :  { %v466_v53 = vpop.eup %465 }
 0x26b   :  { %v362_v54 = vsel %vm355_vm4, %v466_v53, 0.0 }
 0x26c   :  { %363 = vadd.xlane.f32.xlu0 %v362_v54 }
 0x2f9   :  { %v364_v55 = vpop.xlane.xlu0 %363 }
 0x2fa   :  { %467 = vrcp.f32 %v364_v55 }
 0x304   :  { %v468_v56 = vpop.eup %467 }
 0x305   :  { %v366_v57 = vmul.f32 %v468_v56, %v466_v53 }
 0x307   :  { %367 = vst.msk [vmem:[%s695_s6] sm:$0xff] %vm355_vm4, %v366_v57 }
 0x308   :  { %372 = vsyncpa [#allocation3], 1 }
 0x309   :  { %373 = vsyncpa [#allocation5], 1 }
 0x30a   :  { %374 = vsyncpa [#allocation8], 1 }

</bundles_post_ra>
